<compile_context>
chip_gen: v7x
topology: tpu7x:2x2x1
jax: 0.10.0
libtpu: 0.0.40
codegen_flags: <defaults>
</compile_context>

<pallas_src>
import functools

import jax
import jax.numpy as jnp
import numpy as np
from jax.experimental import pallas as pl
from jax.experimental.pallas import tpu as pltpu


# ----------------------------------------------------------------------------
# Config (small, synthetic)
# ----------------------------------------------------------------------------
BATCH = 2
SEQ = 8
HIDDEN = 128
NUM_HEADS = 4
NUM_KV_HEADS = 2
HEAD_DIM = HIDDEN // NUM_HEADS              # 32
NUM_KV_GROUPS = NUM_HEADS // NUM_KV_HEADS   # 2
QKV_OUT = (NUM_HEADS + 2 * NUM_KV_HEADS) * HEAD_DIM   # 256 (lane-dense)
SCALING = HEAD_DIM ** (-0.5)
MASK_VALUE = -1e9                           # additive causal-mask value


# ----------------------------------------------------------------------------
# Fused Pallas kernel: QKV proj + RoPE + causal attention (GQA) + o_proj
# ----------------------------------------------------------------------------
def qwen2_attn_kernel(x_ref, wqkv_ref, bqkv_ref, wo_ref, cos_ref, sins_ref,
                      o_ref, w_ref=None, *,
                      num_heads, num_kv_heads, head_dim):
    """One batch element per grid step.

    x_ref    : (1, S, H)        hidden states (f32, cast to bf16 for the MXU)
    wqkv_ref : (H, NQKV)        fused, pre-transposed q/k/v weight, bf16,
                                softmax scaling pre-folded into the q columns
    bqkv_ref : (1, NQKV)        fused q/k/v bias, f32 (scaling folded into q)
    wo_ref   : (nH*D, H)        pre-transposed o_proj weight, bf16 (no bias)
    cos_ref  : (S, D)           rotary cos (f32)
    sins_ref : (S, D)           rotary sin with the rotate_half sign folded in
    o_ref    : (1, S, H)        attention output after o_proj (f32, lane-dense)
    w_ref    : (1, nH, S, S)    softmax attention weights (debug path only)
    """
    S = x_ref.shape[1]
    D = head_dim
    g = num_heads // num_kv_heads
    half = D // 2

    # Fused QKV projection on the MXU (bf16 operands, f32 accumulate).
    x = x_ref[0].astype(jnp.bfloat16)                              # (S, H)
    qkv = jnp.dot(x, wqkv_ref[...], preferred_element_type=jnp.float32)
    qkv = qkv + bqkv_ref[...]                                      # (S, NQKV) f32

    cos = cos_ref[...]                                             # (S, D)
    sins = sins_ref[...]                                           # sign-folded sin

    def rope(t, reps):
        # t: (reps*S, D) — `reps` heads stacked along sublanes, positions 0..S-1
        # repeated per head.  rotate_half(t)*sin == concat([t2, t1])*sin_signed
        # (sign folded at init).
        # TODO(synk): at prod D=128 replace the concat with pltpu.roll (XLU slot).
        c = jnp.tile(cos, (reps, 1))
        s = jnp.tile(sins, (reps, 1))
        rot = jnp.concatenate([t[:, half:], t[:, :half]], axis=-1)
        return t * c + rot * s

    q_off = 0
    k_off = num_heads * D
    v_off = k_off + num_kv_heads * D

    # Stack heads along sublanes (M) so each score / PV matmul covers a whole
    # KV group: (g*S, D) x (D, S) and (g*S, S) x (S, D).  RoPE is applied once
    # to the whole stacked block.
    q_all = rope(jnp.concatenate(
        [qkv[:, q_off + h * D: q_off + (h + 1) * D] for h in range(num_heads)],
        axis=0), num_heads)                                        # (nH*S, D)
    k_all = rope(jnp.concatenate(
        [qkv[:, k_off + j * D: k_off + (j + 1) * D] for j in range(num_kv_heads)],
        axis=0), num_kv_heads)                                     # (nKV*S, D)

    # Causal mask generated in-kernel (no S^2 mask DMA), tiled over the g
    # query heads of a group.
    row = jax.lax.broadcasted_iota(jnp.int32, (S, S), 0)
    col = jax.lax.broadcasted_iota(jnp.int32, (S, S), 1)
    neg = jnp.where(col <= row, 0.0, MASK_VALUE).astype(jnp.float32)
    neg_g = jnp.tile(neg, (g, 1))                                  # (g*S, S)

    outs = [None] * num_heads
    for j in range(num_kv_heads):                                  # nKV static & small
        k_j = k_all[j * S:(j + 1) * S].astype(jnp.bfloat16)        # (S, D)
        v_j = qkv[:, v_off + j * D: v_off + (j + 1) * D].astype(jnp.bfloat16)
        q_g = q_all[j * g * S:(j + 1) * g * S].astype(jnp.bfloat16)  # (g*S, D)

        # scores = (q * scaling) @ k^T + causal_mask   (scaling pre-folded)
        s = jax.lax.dot_general(q_g, k_j, (((1,), (1,)), ((), ())),
                                preferred_element_type=jnp.float32)  # (g*S, S)
        s = s + neg_g

        # softmax in f32
        m = jnp.max(s, axis=-1, keepdims=True)
        e = jnp.exp(s - m)
        denom = jnp.sum(e, axis=-1, keepdims=True)
        if w_ref is None:
            # perf path: approximate reciprocal on the EUP slot
            p = e * pl.reciprocal(denom, approx=True)
        else:
            # debug path: exact divide so returned weights sum to 1
            p = e / denom
            for i in range(g):
                w_ref[0, j * g + i] = p[i * S:(i + 1) * S]

        out_g = jnp.dot(p.astype(jnp.bfloat16), v_j,
                        preferred_element_type=jnp.float32)        # (g*S, D)
        for i in range(g):
            outs[j * g + i] = out_g[i * S:(i + 1) * S]

    # (S, nH*D) lane-dense concat, then o_proj in the same kernel.
    # TODO(synk): at prod tile sizes write heads into a VMEM scratch at
    # 128-lane-aligned offsets instead of keeping all outputs live + concat.
    attn_cat = jnp.concatenate(outs, axis=-1)                      # (S, nH*D)
    o_ref[0] = jnp.dot(attn_cat.astype(jnp.bfloat16), wo_ref[...],
                       preferred_element_type=jnp.float32)


# ----------------------------------------------------------------------------
# One-time parameter / rotary-table prep (hoisted out of the forward pass)
# ----------------------------------------------------------------------------
def prepare_params(params, *, scaling=SCALING):
    """Fuse q/k/v, pre-transpose to (K, N), fold the softmax scaling into the
    q columns/bias, and cast the matmul weights to bf16 for the MXU."""
    wq = params["wq"] * scaling
    bq = params["bq"] * scaling
    wqkv = jnp.concatenate([wq, params["wk"], params["wv"]], axis=0).T   # (H, NQKV)
    bqkv = jnp.concatenate([bq, params["bk"], params["bv"]])[None, :]    # (1, NQKV)
    return {
        "wqkv": wqkv.astype(jnp.bfloat16),
        "bqkv": bqkv.astype(jnp.float32),
        "wo_t": params["wo"].T.astype(jnp.bfloat16),                     # (nH*D, H)
    }


def prepare_rotary(cos, sin):
    """Fold the rotate_half sign into sin: rotate_half(x)*sin == roll(x)*sin_signed."""
    D = cos.shape[-1]
    assert D % 2 == 0, "head_dim must be even for RoPE sign folding"
    half = D // 2
    sin_signed = jnp.concatenate([-sin[:, :half], sin[:, half:]], axis=-1)
    return cos.astype(jnp.float32), sin_signed.astype(jnp.float32)


# ----------------------------------------------------------------------------
# Forward wrapper
# ----------------------------------------------------------------------------
def qwen2_attention_forward(prepared, hidden_states, cos, sin_signed,
                            return_weights=False):
    """hidden_states: (B, S, H); cos/sin_signed: (S, D) batch-invariant tables.

    Returns (attn_output (B, S, H), attn_weights (B, nH, S, S) or None).
    return_weights=False is the performance path.
    """
    B, S, H = hidden_states.shape
    D = HEAD_DIM

    kernel = functools.partial(
        qwen2_attn_kernel,
        num_heads=NUM_HEADS, num_kv_heads=NUM_KV_HEADS, head_dim=HEAD_DIM)

    in_specs = [
        pl.BlockSpec((1, S, H), lambda b: (b, 0, 0)),                # x
        pl.BlockSpec((H, QKV_OUT), lambda b: (0, 0)),                # W_qkv (resident)
        pl.BlockSpec((1, QKV_OUT), lambda b: (0, 0)),                # b_qkv
        pl.BlockSpec((NUM_HEADS * D, H), lambda b: (0, 0)),          # W_o
        pl.BlockSpec((S, D), lambda b: (0, 0)),                      # cos
        pl.BlockSpec((S, D), lambda b: (0, 0)),                      # sin (signed)
    ]

    if return_weights:
        out_specs = [
            pl.BlockSpec((1, S, H), lambda b: (b, 0, 0)),
            pl.BlockSpec((1, NUM_HEADS, S, S), lambda b: (b, 0, 0, 0)),
        ]
        out_shape = (
            jax.ShapeDtypeStruct((B, S, H), jnp.float32),
            jax.ShapeDtypeStruct((B, NUM_HEADS, S, S), jnp.float32),
        )
    else:
        out_specs = pl.BlockSpec((1, S, H), lambda b: (b, 0, 0))
        out_shape = jax.ShapeDtypeStruct((B, S, H), jnp.float32)

    result = pl.pallas_call(
        kernel,
        grid=(B,),
        in_specs=in_specs,
        out_specs=out_specs,
        out_shape=out_shape,
        compiler_params=pltpu.CompilerParams(
            dimension_semantics=("parallel",)),        # batch slabs -> 2 TCs on v7x
    )(hidden_states, prepared["wqkv"], prepared["bqkv"], prepared["wo_t"],
      cos, sin_signed)

    if return_weights:
        return result[0], result[1]
    return result, None


# ----------------------------------------------------------------------------
# Pure-JAX reference (mirrors the torch eager path) for a sanity check
# ----------------------------------------------------------------------------
def reference_forward(params, x, cos, sin, mask):
    B, S, H = x.shape
    x2d = x.reshape(B * S, H)

    def lin(a, w, b):
        return a @ w.T + b

    q = lin(x2d, params["wq"], params["bq"]).reshape(B, S, NUM_HEADS, HEAD_DIM).transpose(0, 2, 1, 3)
    k = lin(x2d, params["wk"], params["bk"]).reshape(B, S, NUM_KV_HEADS, HEAD_DIM).transpose(0, 2, 1, 3)
    v = lin(x2d, params["wv"], params["bv"]).reshape(B, S, NUM_KV_HEADS, HEAD_DIM).transpose(0, 2, 1, 3)

    def rot_half(t):
        h = t.shape[-1] // 2
        return jnp.concatenate([-t[..., h:], t[..., :h]], axis=-1)

    c = cos[None, None]      # (1, 1, S, D)
    s = sin[None, None]
    q = q * c + rot_half(q) * s
    k = k * c + rot_half(k) * s

    k = jnp.repeat(k, NUM_KV_GROUPS, axis=1)
    v = jnp.repeat(v, NUM_KV_GROUPS, axis=1)

    aw = jnp.einsum("bhqd,bhkd->bhqk", q, k) * SCALING + mask
    aw = jax.nn.softmax(aw.astype(jnp.float32), axis=-1)
    ao = jnp.einsum("bhqk,bhkd->bhqd", aw, v)
    ao = ao.transpose(0, 2, 1, 3).reshape(B * S, NUM_HEADS * HEAD_DIM)
    out = (ao @ params["wo"].T).reshape(B, S, H)
    return out, aw


# ----------------------------------------------------------------------------
# Main
# ----------------------------------------------------------------------------
if __name__ == "__main__":
    key = jax.random.PRNGKey(0)
    keys = jax.random.split(key, 8)

    scale = 0.05
    params = {
        "wq": scale * jax.random.normal(keys[0], (NUM_HEADS * HEAD_DIM, HIDDEN), jnp.float32),
        "bq": scale * jax.random.normal(keys[1], (NUM_HEADS * HEAD_DIM,), jnp.float32),
        "wk": scale * jax.random.normal(keys[2], (NUM_KV_HEADS * HEAD_DIM, HIDDEN), jnp.float32),
        "bk": scale * jax.random.normal(keys[3], (NUM_KV_HEADS * HEAD_DIM,), jnp.float32),
        "wv": scale * jax.random.normal(keys[4], (NUM_KV_HEADS * HEAD_DIM, HIDDEN), jnp.float32),
        "bv": scale * jax.random.normal(keys[5], (NUM_KV_HEADS * HEAD_DIM,), jnp.float32),
        "wo": scale * jax.random.normal(keys[6], (HIDDEN, NUM_HEADS * HEAD_DIM), jnp.float32),
    }

    hidden_states = jax.random.normal(keys[7], (BATCH, SEQ, HIDDEN), jnp.float32)

    # Rotary position embeddings (cos, sin), batch-invariant (S, D).
    positions = jnp.arange(SEQ, dtype=jnp.float32)
    inv_freq = 1.0 / (10000.0 ** (jnp.arange(0, HEAD_DIM, 2, dtype=jnp.float32) / HEAD_DIM))
    freqs = positions[:, None] * inv_freq[None, :]            # (S, D/2)
    emb = jnp.concatenate([freqs, freqs], axis=-1)            # (S, D)
    cos = jnp.cos(emb)
    sin = jnp.sin(emb)

    # Additive causal mask used only by the pure-JAX reference (the kernel
    # builds the identical mask in-kernel from iota).
    causal = jnp.tril(jnp.ones((SEQ, SEQ), jnp.float32))
    attention_mask = jnp.where(causal == 1.0, 0.0, MASK_VALUE)[None, None]
    attention_mask = jnp.broadcast_to(attention_mask, (BATCH, 1, SEQ, SEQ))

    # One-time prep (weight fusion / transpose / scaling fold / RoPE sign fold).
    prepared = prepare_params(params)
    cos_p, sin_signed = prepare_rotary(cos, sin)

    # Performance path (no attention-weights materialization).
    out_fast, _ = qwen2_attention_forward(prepared, hidden_states, cos_p, sin_signed,
                                          return_weights=False)
    jax.block_until_ready(out_fast)

    # Debug path (returns attention weights, exact softmax divide).
    out_dbg, attn_weights = qwen2_attention_forward(prepared, hidden_states, cos_p,
                                                    sin_signed, return_weights=True)
    jax.block_until_ready((out_dbg, attn_weights))

    ref_out, ref_w = reference_forward(params, hidden_states, cos, sin, attention_mask)
    # bf16 MXU operands (and approx reciprocal on the fast path) vs the pure
    # f32 reference -> loosened tolerances.
    np.testing.assert_allclose(np.asarray(out_fast), np.asarray(ref_out), atol=3e-2, rtol=3e-2)
    np.testing.assert_allclose(np.asarray(out_dbg), np.asarray(ref_out), atol=3e-2, rtol=3e-2)
    np.testing.assert_allclose(np.asarray(attn_weights), np.asarray(ref_w), atol=1e-2, rtol=1e-2)

    print("KERNEL_OK")
</pallas_src>

<mosaic_0001>
module attributes {stable_mosaic.version = 11 : i64} {
  func.func @qwen2_attn_kernel(%arg0: i32, %arg1: memref<1x8x128xf32, #tpu.memory_space<vmem>>, %arg2: memref<128x256xbf16, #tpu.memory_space<vmem>>, %arg3: memref<1x256xf32, #tpu.memory_space<vmem>>, %arg4: memref<128x128xbf16, #tpu.memory_space<vmem>>, %arg5: memref<8x32xf32, #tpu.memory_space<vmem>>, %arg6: memref<8x32xf32, #tpu.memory_space<vmem>>, %arg7: memref<1x8x128xf32, #tpu.memory_space<vmem>>) attributes {dimension_semantics = [#tpu.dimension_semantics<parallel>], iteration_bounds = array<i64: 2>, scalar_prefetch = 0 : i64, scratch_operands = 0 : i64, tpu.core_type = #tpu.core_type<tc>, window_params = [{transform_indices = @transform_0, window_bounds = array<i64: 1, 8, 128>}, {pipeline_mode = #tpu.pipeline_mode<synchronous>, transform_indices = @transform_1, window_bounds = array<i64: 128, 256>}, {pipeline_mode = #tpu.pipeline_mode<synchronous>, transform_indices = @transform_2, window_bounds = array<i64: 1, 256>}, {pipeline_mode = #tpu.pipeline_mode<synchronous>, transform_indices = @transform_3, window_bounds = array<i64: 128, 128>}, {pipeline_mode = #tpu.pipeline_mode<synchronous>, transform_indices = @transform_4, window_bounds = array<i64: 8, 32>}, {pipeline_mode = #tpu.pipeline_mode<synchronous>, transform_indices = @transform_5, window_bounds = array<i64: 8, 32>}, {transform_indices = @transform_6, window_bounds = array<i64: 1, 8, 128>}]} {
    %c0 = arith.constant 0 : index
    %c0_0 = arith.constant 0 : index
    %c0_1 = arith.constant 0 : index
    %0 = vector.load %arg1[%c0, %c0_0, %c0_1] : memref<1x8x128xf32, #tpu.memory_space<vmem>>, vector<1x8x128xf32>
    %1 = vector.shape_cast %0 : vector<1x8x128xf32> to vector<8x128xf32>
    %2 = arith.truncf %1 : vector<8x128xf32> to vector<8x128xbf16>
    %c0_2 = arith.constant 0 : index
    %c0_3 = arith.constant 0 : index
    %3 = vector.load %arg2[%c0_2, %c0_3] : memref<128x256xbf16, #tpu.memory_space<vmem>>, vector<128x256xbf16>
    %cst = arith.constant dense<0.000000e+00> : vector<8x256xf32>
    %4 = tpu.matmul %2, %3, %cst {dimension_numbers = #tpu.dot_dimension_numbers<[1], [0], [0], [1], [0, 0, 1, 1], [], []>} : vector<8x128xbf16>, vector<128x256xbf16>, vector<8x256xf32> -> vector<8x256xf32>
    %c0_4 = arith.constant 0 : index
    %c0_5 = arith.constant 0 : index
    %5 = vector.load %arg3[%c0_4, %c0_5] : memref<1x256xf32, #tpu.memory_space<vmem>>, vector<1x256xf32>
    %6 = vector.broadcast %5 : vector<1x256xf32> to vector<8x256xf32>
    %7 = arith.addf %4, %6 : vector<8x256xf32>
    %c0_6 = arith.constant 0 : index
    %c0_7 = arith.constant 0 : index
    %8 = vector.load %arg5[%c0_6, %c0_7] : memref<8x32xf32, #tpu.memory_space<vmem>>, vector<8x32xf32>
    %c0_8 = arith.constant 0 : index
    %c0_9 = arith.constant 0 : index
    %9 = vector.load %arg6[%c0_8, %c0_9] : memref<8x32xf32, #tpu.memory_space<vmem>>, vector<8x32xf32>
    %10 = vector.extract_strided_slice %7 {offsets = [0, 0], sizes = [8, 32], strides = [1, 1]} : vector<8x256xf32> to vector<8x32xf32>
    %11 = vector.extract_strided_slice %7 {offsets = [0, 32], sizes = [8, 32], strides = [1, 1]} : vector<8x256xf32> to vector<8x32xf32>
    %12 = vector.extract_strided_slice %7 {offsets = [0, 64], sizes = [8, 32], strides = [1, 1]} : vector<8x256xf32> to vector<8x32xf32>
    %13 = vector.extract_strided_slice %7 {offsets = [0, 96], sizes = [8, 32], strides = [1, 1]} : vector<8x256xf32> to vector<8x32xf32>
    %14 = tpu.concatenate %10, %11, %12, %13 in 0 : vector<8x32xf32>, vector<8x32xf32>, vector<8x32xf32>, vector<8x32xf32> -> vector<32x32xf32>
    %15 = tpu.concatenate %8, %8, %8, %8 in 0 : vector<8x32xf32>, vector<8x32xf32>, vector<8x32xf32>, vector<8x32xf32> -> vector<32x32xf32>
    %16 = tpu.concatenate %9, %9, %9, %9 in 0 : vector<8x32xf32>, vector<8x32xf32>, vector<8x32xf32>, vector<8x32xf32> -> vector<32x32xf32>
    %17 = vector.extract_strided_slice %14 {offsets = [0, 16], sizes = [32, 16], strides = [1, 1]} : vector<32x32xf32> to vector<32x16xf32>
    %18 = vector.extract_strided_slice %14 {offsets = [0, 0], sizes = [32, 16], strides = [1, 1]} : vector<32x32xf32> to vector<32x16xf32>
    %19 = tpu.concatenate %17, %18 in 1 : vector<32x16xf32>, vector<32x16xf32> -> vector<32x32xf32>
    %20 = arith.mulf %14, %15 : vector<32x32xf32>
    %21 = arith.mulf %19, %16 : vector<32x32xf32>
    %22 = arith.addf %20, %21 : vector<32x32xf32>
    %23 = vector.extract_strided_slice %7 {offsets = [0, 128], sizes = [8, 32], strides = [1, 1]} : vector<8x256xf32> to vector<8x32xf32>
    %24 = vector.extract_strided_slice %7 {offsets = [0, 160], sizes = [8, 32], strides = [1, 1]} : vector<8x256xf32> to vector<8x32xf32>
    %25 = tpu.concatenate %23, %24 in 0 : vector<8x32xf32>, vector<8x32xf32> -> vector<16x32xf32>
    %26 = tpu.concatenate %8, %8 in 0 : vector<8x32xf32>, vector<8x32xf32> -> vector<16x32xf32>
    %27 = tpu.concatenate %9, %9 in 0 : vector<8x32xf32>, vector<8x32xf32> -> vector<16x32xf32>
    %28 = vector.extract_strided_slice %25 {offsets = [0, 16], sizes = [16, 16], strides = [1, 1]} : vector<16x32xf32> to vector<16x16xf32>
    %29 = vector.extract_strided_slice %25 {offsets = [0, 0], sizes = [16, 16], strides = [1, 1]} : vector<16x32xf32> to vector<16x16xf32>
    %30 = tpu.concatenate %28, %29 in 1 : vector<16x16xf32>, vector<16x16xf32> -> vector<16x32xf32>
    %31 = arith.mulf %25, %26 : vector<16x32xf32>
    %32 = arith.mulf %30, %27 : vector<16x32xf32>
    %33 = arith.addf %31, %32 : vector<16x32xf32>
    %34 = tpu.iota {dimensions = array<i32: 0>} : vector<8x8xi32>
    %35 = tpu.iota {dimensions = array<i32: 1>} : vector<8x8xi32>
    %36 = arith.cmpi sle, %35, %34 : vector<8x8xi32>
    %cst_10 = arith.constant 0.000000e+00 : f32
    %cst_11 = arith.constant -1.000000e+09 : f32
    %37 = vector.broadcast %cst_10 : f32 to vector<8x8xf32>
    %38 = vector.broadcast %cst_11 : f32 to vector<8x8xf32>
    %39 = arith.select %36, %37, %38 : vector<8x8xi1>, vector<8x8xf32>
    %40 = tpu.concatenate %39, %39 in 0 : vector<8x8xf32>, vector<8x8xf32> -> vector<16x8xf32>
    %41 = vector.extract_strided_slice %33 {offsets = [0, 0], sizes = [8, 32], strides = [1, 1]} : vector<16x32xf32> to vector<8x32xf32>
    %42 = arith.truncf %41 : vector<8x32xf32> to vector<8x32xbf16>
    %43 = vector.extract_strided_slice %7 {offsets = [0, 192], sizes = [8, 32], strides = [1, 1]} : vector<8x256xf32> to vector<8x32xf32>
    %44 = arith.truncf %43 : vector<8x32xf32> to vector<8x32xbf16>
    %45 = vector.extract_strided_slice %22 {offsets = [0, 0], sizes = [16, 32], strides = [1, 1]} : vector<32x32xf32> to vector<16x32xf32>
    %46 = arith.truncf %45 : vector<16x32xf32> to vector<16x32xbf16>
    %cst_12 = arith.constant dense<0.000000e+00> : vector<16x8xf32>
    %47 = tpu.matmul %46, %42, %cst_12 {dimension_numbers = #tpu.dot_dimension_numbers<[1], [1], [0], [0], [0, 0, 1, 0], [], []>} : vector<16x32xbf16>, vector<8x32xbf16>, vector<16x8xf32> -> vector<16x8xf32>
    %48 = arith.addf %47, %40 : vector<16x8xf32>
    %cst_13 = arith.constant dense<0xFF800000> : vector<16xf32>
    %49 = vector.multi_reduction <maximumf>, %48, %cst_13 [1] : vector<16x8xf32> to vector<16xf32>
    %50 = vector.shape_cast %49 : vector<16xf32> to vector<16x1xf32>
    %51 = vector.broadcast %50 : vector<16x1xf32> to vector<16x8xf32>
    %52 = arith.subf %48, %51 : vector<16x8xf32>
    %53 = math.exp %52 : vector<16x8xf32>
    %cst_14 = arith.constant dense<0.000000e+00> : vector<16xf32>
    %54 = vector.multi_reduction <add>, %53, %cst_14 [1] : vector<16x8xf32> to vector<16xf32>
    %55 = vector.shape_cast %54 : vector<16xf32> to vector<16x1xf32>
    %56 = tpu.reciprocal %55 {approx = true} : vector<16x1xf32> -> vector<16x1xf32>
    %57 = vector.broadcast %56 : vector<16x1xf32> to vector<16x8xf32>
    %58 = arith.mulf %53, %57 : vector<16x8xf32>
    %59 = arith.truncf %58 : vector<16x8xf32> to vector<16x8xbf16>
    %cst_15 = arith.constant dense<0.000000e+00> : vector<16x32xf32>
    %60 = tpu.matmul %59, %44, %cst_15 {dimension_numbers = #tpu.dot_dimension_numbers<[1], [0], [0], [1], [0, 0, 1, 1], [], []>} : vector<16x8xbf16>, vector<8x32xbf16>, vector<16x32xf32> -> vector<16x32xf32>
    %61 = vector.extract_strided_slice %60 {offsets = [0, 0], sizes = [8, 32], strides = [1, 1]} : vector<16x32xf32> to vector<8x32xf32>
    %62 = vector.extract_strided_slice %60 {offsets = [8, 0], sizes = [8, 32], strides = [1, 1]} : vector<16x32xf32> to vector<8x32xf32>
    %63 = vector.extract_strided_slice %33 {offsets = [8, 0], sizes = [8, 32], strides = [1, 1]} : vector<16x32xf32> to vector<8x32xf32>
    %64 = arith.truncf %63 : vector<8x32xf32> to vector<8x32xbf16>
    %65 = vector.extract_strided_slice %7 {offsets = [0, 224], sizes = [8, 32], strides = [1, 1]} : vector<8x256xf32> to vector<8x32xf32>
    %66 = arith.truncf %65 : vector<8x32xf32> to vector<8x32xbf16>
    %67 = vector.extract_strided_slice %22 {offsets = [16, 0], sizes = [16, 32], strides = [1, 1]} : vector<32x32xf32> to vector<16x32xf32>
    %68 = arith.truncf %67 : vector<16x32xf32> to vector<16x32xbf16>
    %cst_16 = arith.constant dense<0.000000e+00> : vector<16x8xf32>
    %69 = tpu.matmul %68, %64, %cst_16 {dimension_numbers = #tpu.dot_dimension_numbers<[1], [1], [0], [0], [0, 0, 1, 0], [], []>} : vector<16x32xbf16>, vector<8x32xbf16>, vector<16x8xf32> -> vector<16x8xf32>
    %70 = arith.addf %69, %40 : vector<16x8xf32>
    %cst_17 = arith.constant dense<0xFF800000> : vector<16xf32>
    %71 = vector.multi_reduction <maximumf>, %70, %cst_17 [1] : vector<16x8xf32> to vector<16xf32>
    %72 = vector.shape_cast %71 : vector<16xf32> to vector<16x1xf32>
    %73 = vector.broadcast %72 : vector<16x1xf32> to vector<16x8xf32>
    %74 = arith.subf %70, %73 : vector<16x8xf32>
    %75 = math.exp %74 : vector<16x8xf32>
    %cst_18 = arith.constant dense<0.000000e+00> : vector<16xf32>
    %76 = vector.multi_reduction <add>, %75, %cst_18 [1] : vector<16x8xf32> to vector<16xf32>
    %77 = vector.shape_cast %76 : vector<16xf32> to vector<16x1xf32>
    %78 = tpu.reciprocal %77 {approx = true} : vector<16x1xf32> -> vector<16x1xf32>
    %79 = vector.broadcast %78 : vector<16x1xf32> to vector<16x8xf32>
    %80 = arith.mulf %75, %79 : vector<16x8xf32>
    %81 = arith.truncf %80 : vector<16x8xf32> to vector<16x8xbf16>
    %cst_19 = arith.constant dense<0.000000e+00> : vector<16x32xf32>
    %82 = tpu.matmul %81, %66, %cst_19 {dimension_numbers = #tpu.dot_dimension_numbers<[1], [0], [0], [1], [0, 0, 1, 1], [], []>} : vector<16x8xbf16>, vector<8x32xbf16>, vector<16x32xf32> -> vector<16x32xf32>
    %83 = vector.extract_strided_slice %82 {offsets = [0, 0], sizes = [8, 32], strides = [1, 1]} : vector<16x32xf32> to vector<8x32xf32>
    %84 = vector.extract_strided_slice %82 {offsets = [8, 0], sizes = [8, 32], strides = [1, 1]} : vector<16x32xf32> to vector<8x32xf32>
    %85 = tpu.concatenate %61, %62, %83, %84 in 1 : vector<8x32xf32>, vector<8x32xf32>, vector<8x32xf32>, vector<8x32xf32> -> vector<8x128xf32>
    %86 = arith.truncf %85 : vector<8x128xf32> to vector<8x128xbf16>
    %c0_20 = arith.constant 0 : index
    %c0_21 = arith.constant 0 : index
    %87 = vector.load %arg4[%c0_20, %c0_21] : memref<128x128xbf16, #tpu.memory_space<vmem>>, vector<128x128xbf16>
    %cst_22 = arith.constant dense<0.000000e+00> : vector<8x128xf32>
    %88 = tpu.matmul %86, %87, %cst_22 {dimension_numbers = #tpu.dot_dimension_numbers<[1], [0], [0], [1], [0, 0, 1, 1], [], []>} : vector<8x128xbf16>, vector<128x128xbf16>, vector<8x128xf32> -> vector<8x128xf32>
    %c0_23 = arith.constant 0 : index
    %c0_24 = arith.constant 0 : index
    %c0_25 = arith.constant 0 : index
    %89 = vector.load %arg7[%c0_23, %c0_24, %c0_25] : memref<1x8x128xf32, #tpu.memory_space<vmem>>, vector<1x8x128xf32>
    %90 = vector.shape_cast %89 : vector<1x8x128xf32> to vector<8x128xf32>
    %91 = vector.shape_cast %88 : vector<8x128xf32> to vector<1x8x128xf32>
    tpu.vector_store %arg7[%c0_23, %c0_24, %c0_25], %91 {strides = array<i32>} : memref<1x8x128xf32, #tpu.memory_space<vmem>>, vector<1x8x128xf32>,
    return
  }
  func.func @transform_0(%arg0: i32) -> (i32, i32, i32) {
    %c0_i32 = arith.constant 0 : i32
    %c0_i32_0 = arith.constant 0 : i32
    %c0_i32_1 = arith.constant 0 : i32
    return %arg0, %c0_i32, %c0_i32_0 : i32, i32, i32
  }
  func.func @transform_1(%arg0: i32) -> (i32, i32) {
    %c0_i32 = arith.constant 0 : i32
    %c0_i32_0 = arith.constant 0 : i32
    %c0_i32_1 = arith.constant 0 : i32
    return %c0_i32, %c0_i32_0 : i32, i32
  }
  func.func @transform_2(%arg0: i32) -> (i32, i32) {
    %c0_i32 = arith.constant 0 : i32
    %c0_i32_0 = arith.constant 0 : i32
    %c0_i32_1 = arith.constant 0 : i32
    return %c0_i32, %c0_i32_0 : i32, i32
  }
  func.func @transform_3(%arg0: i32) -> (i32, i32) {
    %c0_i32 = arith.constant 0 : i32
    %c0_i32_0 = arith.constant 0 : i32
    %c0_i32_1 = arith.constant 0 : i32
    return %c0_i32, %c0_i32_0 : i32, i32
  }
  func.func @transform_4(%arg0: i32) -> (i32, i32) {
    %c0_i32 = arith.constant 0 : i32
    %c0_i32_0 = arith.constant 0 : i32
    %c0_i32_1 = arith.constant 0 : i32
    return %c0_i32, %c0_i32_0 : i32, i32
  }
  func.func @transform_5(%arg0: i32) -> (i32, i32) {
    %c0_i32 = arith.constant 0 : i32
    %c0_i32_0 = arith.constant 0 : i32
    %c0_i32_1 = arith.constant 0 : i32
    return %c0_i32, %c0_i32_0 : i32, i32
  }
  func.func @transform_6(%arg0: i32) -> (i32, i32, i32) {
    %c0_i32 = arith.constant 0 : i32
    %c0_i32_0 = arith.constant 0 : i32
    %c0_i32_1 = arith.constant 0 : i32
    return %arg0, %c0_i32, %c0_i32_0 : i32, i32, i32
  }
}

</mosaic_0001>

<bundles_post_ra>
// kernel: tpu_custom_call.1
= control target key start
LH: loop header
LB: loop body
LE: loop exit
PB: predicated region body
PF: predicated region fallthrough
CT: control target
= control target key end

     0   :  { %11 = vsyncpa [#allocation3], 0  ;;  %s1803_s0 = inlined_call_operand.hbm [shape: f32[2,8,128], index: 0, kind: input, shape index: {}]   ;;  %s1804_s1 = inlined_call_operand.hbm [shape: bf16[128,256], index: 1, kind: input, shape index: {}]   ;;  %s1805_s2 = inlined_call_operand.vmem [shape: f32[1,256], index: 2, kind: input, shape index: {}]   ;;  %s1806_s3 = inlined_call_operand.hbm [shape: bf16[128,128], index: 3, kind: input, shape index: {}]   ;;  %s1807_s4 = inlined_call_operand.vmem [shape: f32[8,32], index: 4, kind: input, shape index: {}]   ;;  %s1808_s5 = inlined_call_operand.vmem [shape: f32[8,32], index: 5, kind: input, shape index: {}]   ;;  %s1809_s6 = inlined_call_operand.hbm [shape: f32[2,8,128], index: 6, kind: output, shape index: {}]  }
   0x1   :  { %13 = vsyncpa [#allocation3 + $0x1], 0 }
   0x2   :  { %14 = vsyncpa [#allocation6], 0 }
   0x3   :  { %15 = vsyncpa [#allocation4], 0 }
   0x4   :  { %17 = vsyncpa [#allocation4 + $0x1], 0  ;;  %s1447_s21 = smov 0   ;;  %s1449_s22 = smov 0  }
   0x5   :  { %s1451_s23 = smov 0   ;;  %s1453_s24 = smov 0  }
   0x6 LB: > { %s1468_s25 = sadd.s32 4294967295, %s1393_s24   ;;  %s1004_s26 = sadd.s32 4294967294, %s1393_s24   ;;  %s1393_s24 = sphi %s1453_s24, %s1829_s24   ;;  %s1389_s23 = sphi %s1451_s23, %s1828_s23   ;;  %s1385_s22 = sphi %s1449_s22, %s1827_s22   ;;  %s1381_s21 = sphi %s1447_s21, %s1826_s21  }
   0x7   : > { %p43_p0 = scmp.ne.s32.totalorder %s1385_s22, %s1381_s21  ;;  %p1810_p1 = scmp.eq.s32.totalorder %s1468_s25, 0 }
   0x8   : > { %p178_p3 = scmp.eq.s32.totalorder %s1004_s26, 1  ;;  %p1005_p5 = scmp.ge.s32.totalorder %s1393_s24, 1 }
   0x9   : > { %p1477_p4 = por %p1810_p1, %p43_p0  ;;  %p185_p7 = scmp.lt.s32.totalorder %s1393_s24, 3 }
   0xa   : > { %p1482_p6 = por %p178_p3, %p43_p0  ;;  %s1395_s30 = smov [#allocation5]  }
   0xb   : > { %s1813_s27 = scalar_select %p1477_p4, 1, 0 }
   0xc   : > { %s1814_s28 = scalar_select %p1482_p6, 1, 0 }
   0xd   : > { %p1487_p8 = pnand %p1005_p5, %p185_p7  ;;  %s197_s7 = sshll.u32 %s1395_s30, 4  ;;  %s1491_s7 = int_to_ptr.vmem [resolvable:$true] %s197_s7 }
   0xe   : > { %s1396_s9 = smov [#allocation7]   ;;  %s1237_s13 = scalar_lea.hbm %s1804_s1, 2048 }
   0xf   : > { %p1121_p9 = pneg %p1487_p8  ;;  %s213_s10 = sshll.u32 %s1396_s9, 4  ;;  %s1502_s10 = int_to_ptr.vmem [resolvable:$true] %s213_s10 }
  0x10   : > { %p1238_p12 = scmp.ne.s32.totalorder %s1804_s1, %s1237_s13  ;;  %p1244_p5 = scmp.lt.u32.totalorder %s1237_s13, %s1804_s1 }
  0x11   : > { %p1498_p11 = pnand %p1121_p9, %p1810_p1 }
  0x13   : > { %p1239_p13 = pneg %p1498_p11 }
  0x15   : > { %p1240_p0 = pnand %p1239_p13, %p1238_p12 }
  0x17   : > { %p1241_p3 = pneg %p1240_p0 }
  0x19   : > { %p1246_p7 = pnand %p1244_p5, %p1241_p3 }
  0x1b   : > { %1249 = shalt.err (!%p1246_p7)
}
  0x1c   : > { %s1250_s18 = scalar_lea.vmem %s1491_s7, 2048  ;;  %p1258_p2 = scmp.lt.s32.totalorder %s1491_s7, %s1491_s7 }
  0x1d   : > { %p1251_p9 = scmp.ne.s32.totalorder %s1491_s7, %s1250_s18  ;;  %p1259_p12 = scmp.lt.s32.totalorder %s1250_s18, %s1250_s18 }
  0x1f   : > { %p1253_p10 = pnand %p1251_p9, %p1239_p13  ;;  %p1260_p0 = por %p1259_p12, %p1258_p2 }
  0x21   : > { %p1254_p1 = pneg %p1253_p10 }
  0x23   : > { %p1261_p6 = pnand %p1260_p0, %p1254_p1 }
  0x25   : > { %1264 = shalt.err (!%p1261_p6)
}
  0x26   : > { %s1397_s19 = smov 128   ;;  %s1398_s20 = smov 8  }
  0x27   : > { %1124 = dma.hbm_to_vmem [thread:$0]  (!%p1498_p11), %s1804_s1, 2048, %s1491_s7, [#allocation6], %s1397_s19, %s1397_s19, %s1398_s20  }
  0x28   : > { %s1265_s12 = scalar_lea.hbm %s1806_s3, 1024 }
  0x29   : > { %p1266_p2 = scmp.ne.s32.totalorder %s1806_s3, %s1265_s12  ;;  %p1272_p10 = scmp.lt.u32.totalorder %s1265_s12, %s1806_s3 }
  0x2b   : > { %p1268_p1 = pnand %p1266_p2, %p1239_p13 }
  0x2d   : > { %p1269_p6 = pneg %p1268_p1 }
  0x2f   : > { %p1274_p3 = pnand %p1272_p10, %p1269_p6 }
  0x31   : > { %1277 = shalt.err (!%p1274_p3)
}
  0x32   : > { %s1278_s7 = scalar_lea.vmem %s1502_s10, 1024  ;;  %p1286_p12 = scmp.lt.s32.totalorder %s1502_s10, %s1502_s10 }
  0x33   : > { %p1279_p5 = scmp.ne.s32.totalorder %s1502_s10, %s1278_s7  ;;  %p1287_p0 = scmp.lt.s32.totalorder %s1278_s7, %s1278_s7 }
  0x35   : > { %p1281_p7 = pnand %p1279_p5, %p1239_p13  ;;  %p1288_p2 = por %p1287_p0, %p1286_p12 }
  0x37   : > { %p1282_p9 = pneg %p1281_p7 }
  0x39   : > { %p1289_p1 = pnand %p1288_p2, %p1282_p9 }
  0x3b   : > { %1292 = shalt.err (!%p1289_p1)
}
  0x3c   : > { %s1399_s17 = smov 64   ;;  %s1400_s18 = smov 4  }
  0x3d   : > { %1127 = dma.hbm_to_vmem [thread:$0]  (!%p1498_p11), %s1806_s3, 1024, %s1502_s10, [#allocation6], %s1399_s17, %s1399_s17, %s1400_s18  }
  0x3e   : > { %s1557_s26 = sadd.s32 1, %s1393_s24   ;;  %s30_s9 = sadd.s32 1, %s1389_s23 }
  0x3f   : > { %s27_s30 = ssub.s32 %s1393_s24, %s1557_s26  ;;  %p37_p6 = scmp.ne.s32.totalorder %s1389_s23, %s1385_s22 }
  0x40   : > { %p28_p13 = scmp.eq.s32.totalorder %s27_s30, 0  ;;  %p38_p10 = scmp.eq.s32.totalorder %s1393_s24, 0 }
  0x41   : > { %p1817_p5 = scmp.eq.s32.totalorder %s1468_s25, 1  ;;  %p1138_p9 = scmp.lt.s32.totalorder %s1393_s24, 2 }
  0x42   : > { %s1566_s11 = scalar_select %p28_p13, %s1389_s23, %s30_s9  }
  0x43   : > { %p39_p3 = por %p38_p10, %p37_p6  ;;  %p1570_p7 = por %p1817_p5, %p37_p6 }
  0x44   : > { %s233_s8 = sand.u32 1, %s1389_s23   ;;  %s1010_s10 = sshll.u32 %s1393_s24, 7 }
  0x45   : > { %s1818_s12 = scalar_select %p1570_p7, 1, 0 }
  0x46   : > { %s1009_s13 = sshll.u32 %s233_s8, 3  ;;  %s1580_s16 = scalar_lea.hbm %s1803_s0, %s1010_s10 }
  0x47   : > { %s237_s7 = scalar_lea.vmem [#allocation2], %s1009_s13  ;;  %p1584_p11 = pnand %p1138_p9, %p39_p3 }
  0x48   : > { %s244_s17 = sshll.u32 %s237_s7, 4  ;;  %s234_s19 = scalar_lea.sflag [#allocation3], %s233_s8  ;;  %s1582_s17 = int_to_ptr.vmem [resolvable:$true] %s244_s17 }
  0x49   : > { %s1293_s20 = scalar_lea.hbm %s1580_s16, 128  ;;  %p1295_p0 = pneg %p1584_p11 }
  0x4a   : > { %p1294_p12 = scmp.ne.s32.totalorder %s1580_s16, %s1293_s20  ;;  %s1298_s13 = scalar_lea.hbm %s1803_s0, 256 }
  0x4b   : > { %p1299_p13 = scmp.lt.u32.totalorder %s1580_s16, %s1803_s0  ;;  %p1300_p6 = scmp.lt.u32.totalorder %s1298_s13, %s1293_s20 }
  0x4c   : > { %p1296_p2 = pnand %p1295_p0, %p1294_p12  ;;  %p1302_p3 = scmp.lt.u32.totalorder %s1293_s20, %s1580_s16 }
  0x4d   : > { %p1301_p10 = por %p1300_p6, %p1299_p13 }
  0x4e   : > { %p1297_p1 = pneg %p1296_p2 }
  0x4f   : > { %p1303_p5 = por %p1302_p3, %p1301_p10 }
  0x51   : > { %p1304_p9 = pnand %p1303_p5, %p1297_p1 }
  0x53   : > { %1307 = shalt.err (!%p1304_p9)
}
  0x54   : > { %s1308_s8 = scalar_lea.vmem %s1582_s17, 128  ;;  %s1401_s15 = smov [#allocation2]  }
  0x55   : > { %p1309_p12 = scmp.ne.s32.totalorder %s1582_s17, %s1308_s8  ;;  %s1313_s7 = sshll.u32 %s1401_s15, 4  ;;  %s1314_s7 = int_to_ptr.vmem [resolvable:$false] %s1313_s7 }
  0x56   : > { %s1315_s30 = scalar_lea.vmem %s1314_s7, 256  ;;  %p1316_p4 = scmp.lt.s32.totalorder %s1582_s17, %s1314_s7 }
  0x57   : > { %p1311_p2 = pnand %p1309_p12, %p1295_p0  ;;  %p1317_p13 = scmp.lt.s32.totalorder %s1315_s30, %s1308_s8 }
  0x59   : > { %p1312_p7 = pneg %p1311_p2  ;;  %p1318_p6 = por %p1317_p13, %p1316_p4 }
  0x5b   : > { %p1319_p10 = pnand %p1318_p6, %p1312_p7 }
  0x5d   : > { %1322 = shalt.err (!%p1319_p10)
}
  0x5e   : > { %1131 = dma.hbm_to_vmem [thread:$0]  (!%p1584_p11), %s1580_s16, 128, %s1582_s17, %s234_s19  }
  0x5f   : > { %253 = sbr.rel (%p1487_p8) target bundleno = 2253 (0x8cd), region = 44  ;;  %s1616_s20 = sand.u32 (!%p1487_p8), 1, %s1385_s22  }
  0x60   : > { %s1012_s9 = sshll.u32 (!%p1487_p8), %s1616_s20, 3  ;;  %s256_s13 = scalar_lea.sflag (!%p1487_p8), [#allocation3], %s1616_s20 }
  0x61   : > { %s1622_s10 = scalar_lea.vmem (!%p1487_p8), [#allocation2], %s1012_s9  ;;  %p1820_p4 = scmp.ne.s32.totalorder (!%p1487_p8), %s1813_s27, 0 }
  0x66   : > { %1368 = dma.done.wait (%p1820_p4), %s256_s13, 128  }
  0x67   : > { %1370 = vsyncadd (%p1820_p4), %s256_s13, 4294967168  ;;  %p1821_p7 = scmp.eq.s32.totalorder %s1468_s25, 0 }
  0x69   : > { %1372 = dma.done.wait (%p1821_p7), [#allocation6], 3072   ;;  %p1822_p8 = pmov %p1821_p7 }
  0x6a   : > { %v1402_v0 = vmov 0   ;;  %v1189_v1 = vld [vmem:[#allocation5 + $0x4] ss:$8 sps:$4 sm:$0xff]   ;;  %v1191_v2 = vld [vmem:[#allocation5] ss:$8 sps:$4 sm:$0xff]   ;;  %v297_v17 = vld [vmem:[%s1622_s10] sm:$0xff]  ;;  %v317_v19 = vlaneseq }
  0x6b   : > { %1374 = vsyncadd (%p1822_p8), [#allocation6], 4294964224  ;;  %439 = vmatprep.mubr.bf16.mxu0 %v1402_v0  ;;  %407 = vmatprep.subr.bf16.mxu0 %v1189_v1  ;;  %v1192_v3 = vld [vmem:[#allocation5 + $0x14] ss:$8 sps:$4 sm:$0xff]   ;;  %v1194_v4 = vld [vmem:[#allocation5 + $0x10] ss:$8 sps:$4 sm:$0xff]   ;;  %v298_v18 = vpack.c.bf16 %v297_v17, %v297_v17 }
  0x6c   : > { %408 = vmatpush1.bf16.msra.mxu0 %v1191_v2  ;;  %v1195_v5 = vld [vmem:[#allocation5 + $0x24] ss:$8 sps:$4 sm:$0xff]   ;;  %v1197_v6 = vld [vmem:[#allocation5 + $0x20] ss:$8 sps:$4 sm:$0xff]   ;;  %v1198_v7 = vld [vmem:[#allocation5 + $0x34] ss:$8 sps:$4 sm:$0xff]  }
  0x6d   : > { %409 = vmatprep.subr.bf16.mxu0 %v1192_v3  ;;  %v1200_v8 = vld [vmem:[#allocation5 + $0x30] ss:$8 sps:$4 sm:$0xff]   ;;  %v1201_v9 = vld [vmem:[#allocation5 + $0x44] ss:$8 sps:$4 sm:$0xff]   ;;  %v1203_v10 = vld [vmem:[#allocation5 + $0x40] ss:$8 sps:$4 sm:$0xff]  }
  0x6e   : > { %v1204_v11 = vld [vmem:[#allocation5 + $0x54] ss:$8 sps:$4 sm:$0xff]   ;;  %v1206_v12 = vld [vmem:[#allocation5 + $0x50] ss:$8 sps:$4 sm:$0xff]   ;;  %v1207_v13 = vld [vmem:[#allocation5 + $0x64] ss:$8 sps:$4 sm:$0xff]  }
  0x6f   : > { %v1209_v14 = vld [vmem:[#allocation5 + $0x60] ss:$8 sps:$4 sm:$0xff]   ;;  %v1210_v15 = vld [vmem:[#allocation5 + $0x74] ss:$8 sps:$4 sm:$0xff]   ;;  %v1212_v16 = vld [vmem:[#allocation5 + $0x70] ss:$8 sps:$4 sm:$0xff]  }
  0x70   : > { %410 = vmatpush1.bf16.msra.mxu0 %v1194_v4  ;;  %v318_v20 = vshrl.u32 %v317_v19, 7  ;;  %v315_v22 = vld [vmem:[%s1805_s2] sm:$0x3]  ;;  %v1403_v29 = vmov 0.0   ;;  %s1404_s16 = smov 96   ;;  %s1405_s17 = smov 16  }
  0x71   : > { %411 = vmatprep.subr.bf16.mxu0 %v1195_v5  ;;  %1065 = vmatprep.subr.bf16.mxu1 %v1403_v29  ;;  %s1406_s18 = smov 112   ;;  %vm1407_vm0 = vmmov 0   ;;  %vm484_vm1 = vcmask 130048   ;;  %v1660_v34 = vld [vmem:[%s1807_s4] sm:$0xff]  ;;  %vm534_vm2 = vcmask 261120   ;;  %v528_v57 = vand.u32 127, %v317_v19 }
  0x72   : > { %v319_v21 = vsub.s32 0, %v318_v20  ;;  %v323_v23 = vsub.s32 1, %v318_v20  ;;  %1067 = vmatprep.mubr.msk.bf16.mxu1 %vm1407_vm0, %v1403_v29  ;;  %v1665_v35 = vld [vmem:[%s1808_s5] sm:$0xff]  ;;  %v1408_v58 = vmov -1e+09   ;;  %vm582_vm4 = vcmask 64512  }
  0x73   : > { %vm529_vm3 = vcmp.le.s32.totalorder %v528_v57, %v318_v20  ;;  %s1409_s7 = smov 64   ;;  %s1410_s30 = smov 32   ;;  %vm612_vm5 = vcmask 1043456   ;;  %vm791_vm6 = vcmask 523264   ;;  %vm793_vm7 = vcmask 785408  }
  0x74   : > { %412 = vmatpush1.bf16.msra.mxu0 %v1197_v6  ;;  %v320_v24 = vrot.slane %v315_v22, %v319_v21  ;;  %v324_v25 = vrot.slane %v315_v22, %v323_v23  ;;  %v1684_v59 = vsel %vm529_vm3, 0.0, %v1408_v58  ;;  %s295_s13 = scalar_lea.vmem [#allocation8], %s1012_s9  ;;  %s1045_s27 = sshll.u32 %s1468_s25, 7 }
  0x75   : > { %413 = vmatprep.subr.bf16.mxu0 %v1198_v7  ;;  %s915_s10 = sshll.u32 %s295_s13, 4  ;;  %p1823_p0 = scmp.ne.s32.totalorder %s1818_s12, 0  ;;  %s1756_s10 = int_to_ptr.vmem [resolvable:$true] %s915_s10 }
  0x76   : > { %s1323_s19 = scalar_lea.vmem %s1756_s10, 128  ;;  %s1411_s25 = smov [#allocation8]  }
  0x77   : > { %p1324_p11 = scmp.ne.s32.totalorder %s1756_s10, %s1323_s19  ;;  %s1327_s9 = sshll.u32 %s1411_s25, 4  ;;  %s1328_s9 = int_to_ptr.vmem [resolvable:$false] %s1327_s9 }
  0x78   : > { %414 = vmatpush1.bf16.msra.mxu0 %v1200_v8  ;;  %s1329_s14 = scalar_lea.vmem %s1328_s9, 256  ;;  %p1330_p5 = scmp.lt.s32.totalorder %s1756_s10, %s1328_s9 }
  0x79   : > { %415 = vmatprep.subr.bf16.mxu0 %v1201_v9  ;;  %p1325_p1 = pnand %p1324_p11, %p1823_p0  ;;  %p1331_p9 = scmp.lt.s32.totalorder %s1329_s14, %s1323_s19 }
  0x7b   : > { %p1326_p3 = pneg %p1325_p1  ;;  %p1332_p12 = por %p1331_p9, %p1330_p5 }
  0x7c   : > { %416 = vmatpush1.bf16.msra.mxu0 %v1203_v10 }
  0x7d   : > { %417 = vmatprep.subr.bf16.mxu0 %v1204_v11  ;;  %p1333_p2 = pnand %p1332_p12, %p1326_p3 }
  0x80   : > { %418 = vmatpush1.bf16.msra.mxu0 %v1206_v12 }
  0x81   : > { %419 = vmatprep.subr.bf16.mxu0 %v1207_v13 }
  0x84   : > { %420 = vmatpush1.bf16.msra.mxu0 %v1209_v14 }
  0x85   : > { %421 = vmatprep.subr.bf16.mxu0 %v1210_v15 }
  0x88   : > { %422 = vmatpush1.bf16.msra.mxu0 %v1212_v16 }
  0x89   : > { %1089 = vmatprep.subr.bf16.mxu0 %v1403_v29 }
  0x8b   : > { %440 = vmatmul.mubr.bf16.vlgmr.msra.gmra.mrb[0].mxu0 %v298_v18 }
  0x8c   : > { %1105 = vmatprep.mubr.msk.bf16.mxu0 %vm1407_vm0, %v1403_v29 }
 0x15e   : > { %v441_v26 = vpop.f32.mrb[0].mxu0 }
 0x15f   : > { %v1636_v27 = vadd.f32 %v441_v26, %v320_v24  ;;  %v443_v28 = vpop.f32.mrb[1].mxu0 }
 0x160   : > { %v1640_v30 = vadd.f32 %v443_v28, %v324_v25  ;;  %v445_v31 = vpop.f32.mrb[2].mxu0 }
 0x161   : > { %v446_v32 = vpop.f32.mrb[3].mxu0  ;;  %451 = vrot.lane.b32.xlu0 %v1636_v27, %s1404_s16  ;;  %v489_v52 = vmul.f32 %v1660_v34, %v1636_v27 }
 0x162   : > { %511 = vrot.lane.b32.xlu1 %v1640_v30, %s1405_s17  ;;  %v519_v40 = vmul.f32 %v1660_v34, %v1640_v30  ;;  %v1698_v4 = vpack.c.bf16 %v1640_v30, %v1640_v30 }
 0x165   : > { %505 = vrot.lane.b32.xlu0 %v1640_v30, %s1406_s18 }
 0x166   : > { %460 = vrot.lane.b32.xlu1 %v1636_v27, %s1406_s18 }
 0x16a   : > { %472 = vrot.lane.b32.xlu1 %v1636_v27, %s1405_s17 }
 0x1d3   : > { %v452_v33 = vpop.permute.xlu0 %451 }
 0x1d4   : > { %462 = vrot.lane.b32.xlu0 %v452_v33, %s1406_s18  ;;  %v512_v36 = vpop.permute.xlu1 %511  ;;  %v490_v51 = vmul.f32 %v452_v33, %v1660_v34 }
 0x1d7   : > { %v506_v37 = vpop.permute.xlu0 %505 }
 0x1d8   : > { %v517_v38 = vsel %vm484_vm1, %v506_v37, %v512_v36  ;;  %474 = vrot.lane.b32.xlu0 %v452_v33, %s1405_s17  ;;  %v461_v44 = vpop.permute.xlu1 %460 }
 0x1d9   : > { %v521_v39 = vmul.f32 %v517_v38, %v1665_v35 }
 0x1db   : > { %v523_v41 = vadd.f32 %v521_v39, %v519_v40 }
 0x1dc   : > { %v473_v45 = vpop.permute.xlu1 %472 }
 0x1dd   : > { %v531_v42 = vpack.c.bf16 %v523_v41, %v523_v41  ;;  %v485_v47 = vsel %vm484_vm1, %v461_v44, %v473_v45 }
 0x1de   : > { %v493_v48 = vmul.f32 %v485_v47, %v1665_v35 }
 0x1df   : > { %v539_v43 = vsel %vm534_vm2, %v531_v42, 0 }
 0x1e0   : > { %1066 = vmatpush3.bf16.xpose.msra.mxu1 %v539_v43  ;;  %v497_v54 = vadd.f32 %v493_v48, %v489_v52 }
 0x1e1   : > { %1071 = vmatprep.subr.bf16.mxu1 %v1403_v29 }
 0x246   : > { %v463_v46 = vpop.permute.xlu0 %462 }
 0x24a   : > { %v475_v49 = vpop.permute.xlu0 %474 }
 0x24b   : > { %v486_v50 = vsel %vm484_vm1, %v463_v46, %v475_v49 }
 0x24c   : > { %v494_v53 = vmul.f32 %v486_v50, %v1665_v35 }
 0x24e   : > { %v498_v55 = vadd.f32 %v494_v53, %v490_v51 }
 0x250   : > { %v533_v56 = vpack.c.bf16 %v498_v55, %v497_v54 }
 0x252   : > { %1068 = vmatmul.mubr.msk.bf16.vlgmr.msra.gmra.mrb[0].mxu1 %vm534_vm2, %v533_v56 }
 0x253   : > { %1073 = vmatprep.mubr.msk.bf16.mxu1 %vm1407_vm0, %v1403_v29 }
 0x325   : > { %v575_v60 = vpop.f32.mrb[0].mxu1 }
 0x326   : > { %v576_v61 = vadd.f32 %v575_v60, %v1684_v59  ;;  %v1069_v62 = vpop.f32.mrb[1].mxu1 }
 0x327   : > { %v578_v63 = vpop.f32.mrb[2].mxu1 }
 0x328   : > { %v579_v0 = vadd.f32 %v578_v63, %v1684_v59  ;;  %v1070_v1 = vpop.f32.mrb[3].mxu1  ;;  %v583_v2 = vsel %vm582_vm4, %v576_v61, -inf }
 0x329   : > { %584 = vmax.xlane.f32.xlu1 %v583_v2 }
 0x32a   : > { %v586_v3 = vsel %vm582_vm4, %v579_v0, -inf }
 0x32b   : > { %587 = vmax.xlane.f32.xlu0 %v586_v3 }
 0x33a   : > { %454 = vrot.lane.b32.xlu1 %v1636_v27, %s1409_s7 }
 0x33e   : > { %457 = vrot.lane.b32.xlu1 %v1636_v27, %s1410_s30 }
 0x341   : > { %502 = vrot.lane.b32.xlu0 %v1640_v30, %s1404_s16 }
 0x345   : > { %607 = vrot.lane.b32.xlu0 %v1698_v4, %s1409_s7 }
 0x3b6   : > { %v585_v5 = vpop.xlane.xlu1 %584 }
 0x3b7   : > { %v589_v12 = vsub.f32 %v576_v61, %v585_v5 }
 0x3b8   : > { %v588_v6 = vpop.xlane.xlu0 %587 }
 0x3b9   : > { %v591_v13 = vmul.f32 1.442695, %v589_v12  ;;  %v590_v14 = vsub.f32 %v579_v0, %v588_v6 }
 0x3ba   : > { %v455_v7 = vpop.permute.xlu1 %454 }
 0x3bb   : > { %1221 = vpow2.f32 %v591_v13  ;;  %v593_v15 = vmul.f32 1.442695, %v590_v14  ;;  %v491_v44 = vmul.f32 %v455_v7, %v1660_v34 }
 0x3bc   : > { %v503_v8 = vpop.permute.xlu0 %502 }
 0x3bd   : > { %513 = vrot.lane.b32.xlu0 %v503_v8, %s1405_s17  ;;  %507 = vrot.lane.b32.xlu1 %v503_v8, %s1406_s18  ;;  %1223 = vpow2.f32 %v593_v15  ;;  %v520_v28 = vmul.f32 %v503_v8, %v1660_v34 }
 0x3be   : > { %v458_v9 = vpop.permute.xlu1 %457 }
 0x3bf   : > { %v492_v47 = vmul.f32 %v458_v9, %v1660_v34 }
 0x3c0   : > { %v608_v10 = vpop.permute.xlu0 %607 }
 0x3c1   : > { %v614_v11 = vsel %vm612_vm5, %v608_v10, 0  ;;  %466 = vrot.lane.b32.xlu0 %v458_v9, %s1406_s18  ;;  %464 = vrot.lane.b32.xlu1 %v455_v7, %s1406_s18  ;;  %s902_s18 = scalar_lea.sflag [#allocation4], %s1616_s20 }
 0x3c2   : > { %1072 = vmatpush3.bf16.msra.mxu1 %v614_v11 }
 0x3c3   : > { %1077 = vmatprep.subr.bf16.mxu1 %v1403_v29 }
 0x3c5   : > { %v1222_v16 = vpop.eup %1221 }
 0x3c6   : > { %v595_v17 = vsel %vm582_vm4, %v1222_v16, 0.0 }
 0x3c7   : > { %v1224_v18 = vpop.eup %1223 }
 0x3c8   : > { %v598_v19 = vsel %vm582_vm4, %v1224_v18, 0.0 }
 0x3e0   : > { %596 = vadd.xlane.f32.xlu0 %v595_v17  ;;  %v1213_v17 = vld [vmem:[#allocation7] sm:$0xff]  }
 0x3e1   : > { %1090 = vmatpush3.bf16.msra.mxu0 %v1213_v17 }
 0x3e2   : > { %1091 = vmatprep.subr.bf16.mxu0 %v1403_v29 }
 0x3e5   : > { %599 = vadd.xlane.f32.xlu1 %v598_v19  ;;  %v1216_v19 = vld [vmem:[#allocation7 + $0x18] sm:$0xff]  }
 0x3f6   : > { %478 = vrot.lane.b32.xlu0 %v458_v9, %s1405_s17  ;;  %476 = vrot.lane.b32.xlu1 %v455_v7, %s1405_s17  ;;  %s1761_s17 = scalar_lea.hbm %s1809_s6, %s1045_s27 }
 0x42f   : > { %v514_v20 = vpop.permute.xlu0 %513  ;;  %v508_v21 = vpop.permute.xlu1 %507 }
 0x430   : > { %v518_v26 = vsel %vm484_vm1, %v508_v21, %v514_v20  ;;  %v1217_v20 = vld [vmem:[#allocation7 + $0x20] sm:$0xff]   ;;  %v1218_v21 = vld [vmem:[#allocation7 + $0x28] sm:$0xff]  }
 0x431   : > { %v522_v27 = vmul.f32 %v518_v26, %v1665_v35 }
 0x433   : > { %v467_v22 = vpop.permute.xlu0 %466  ;;  %v465_v23 = vpop.permute.xlu1 %464  ;;  %v524_v30 = vadd.f32 %v522_v27, %v520_v28 }
 0x435   : > { %v657_v38 = vpack.c.bf16 %v524_v30, %v524_v30 }
 0x437   : > { %v663_v46 = vsel %vm534_vm2, %v657_v38, 0 }
 0x46d   : > { %v597_v24 = vpop.xlane.xlu0 %596 }
 0x46e   : > { %1225 = vrcp.f32 %v597_v24 }
 0x471   : > { %v479_v33 = vpop.permute.xlu0 %478 }
 0x472   : > { %v600_v25 = vpop.xlane.xlu1 %599  ;;  %v488_v41 = vsel %vm484_vm1, %v467_v22, %v479_v33  ;;  %v1219_v22 = vld [vmem:[#allocation7 + $0x30] sm:$0xff]  }
 0x473   : > { %1227 = vrcp.f32 %v600_v25  ;;  %v496_v45 = vmul.f32 %v488_v41, %v1665_v35 }
 0x475   : > { %v500_v49 = vadd.f32 %v496_v45, %v492_v47 }
 0x476   : > { %v477_v31 = vpop.permute.xlu1 %476 }
 0x477   : > { %v487_v37 = vsel %vm484_vm1, %v465_v23, %v477_v31  ;;  %v1220_v23 = vld [vmem:[#allocation7 + $0x38] sm:$0xff]  }
 0x478   : > { %v1226_v32 = vpop.eup %1225  ;;  %v495_v42 = vmul.f32 %v487_v37, %v1665_v35 }
 0x479   : > { %v603_v39 = vmul.f32 %v1226_v32, %v1222_v16 }
 0x47a   : > { %v499_v48 = vadd.f32 %v495_v42, %v491_v44 }
 0x47c   : > { %v658_v50 = vpack.c.bf16 %v500_v49, %v499_v48 }
 0x47d   : > { %v1228_v36 = vpop.eup %1227 }
 0x47e   : > { %v604_v40 = vmul.f32 %v1228_v36, %v1224_v18  ;;  %v1214_v18 = vld [vmem:[#allocation7 + $0x8] sm:$0xff]  }
 0x47f   : > { %1092 = vmatpush3.bf16.msra.mxu0 %v1214_v18 }
 0x480   : > { %v605_v43 = vpack.c.bf16 %v604_v40, %v603_v39  ;;  %1093 = vmatprep.subr.bf16.mxu0 %v1403_v29 }
 0x482   : > { %1074 = vmatmul.mubr.msk.bf16.vlgmr.msra.gmra.mrb[4].mxu1 %vm582_vm4, %v605_v43 }
 0x483   : > { %1078 = vmatpush3.bf16.xpose.msra.mxu1 %v663_v46  ;;  %1079 = vmatprep.mubr.msk.bf16.mxu1 %vm1407_vm0, %v1403_v29 }
 0x484   : > { %1083 = vmatprep.subr.bf16.mxu1 %v1403_v29 }
 0x48a   : > { %1080 = vmatmul.mubr.msk.bf16.vlgmr.msra.gmra.mrb[8].mxu1 %vm534_vm2, %v658_v50 }
 0x48b   : > { %1085 = vmatprep.mubr.msk.bf16.mxu1 %vm1407_vm0, %v1403_v29 }
 0x555   : > { %v1729_v35 = vpop.f32.mrb[4].mxu1 }
 0x556   : > { %v1075_v51 = vpop.f32.mrb[5].mxu1 }
 0x557   : > { %v653_v52 = vpop.f32.mrb[6].mxu1 }
 0x558   : > { %v1076_v53 = vpop.f32.mrb[7].mxu1 }
 0x55d   : > { %v699_v54 = vpop.f32.mrb[8].mxu1 }
 0x55e   : > { %v700_v55 = vadd.f32 %v699_v54, %v1684_v59  ;;  %v1081_v56 = vpop.f32.mrb[9].mxu1 }
 0x55f   : > { %v702_v34 = vpop.f32.mrb[10].mxu1 }
 0x560   : > { %v703_v57 = vadd.f32 %v702_v34, %v1684_v59  ;;  %v1082_v58 = vpop.f32.mrb[11].mxu1  ;;  %v706_v60 = vsel %vm582_vm4, %v700_v55, -inf }
 0x561   : > { %707 = vmax.xlane.f32.xlu1 %v706_v60 }
 0x562   : > { %v709_v61 = vsel %vm582_vm4, %v703_v57, -inf }
 0x563   : > { %710 = vmax.xlane.f32.xlu0 %v709_v61 }
 0x5ee   : > { %v708_v62 = vpop.xlane.xlu1 %707 }
 0x5ef   : > { %v712_v63 = vsub.f32 %v700_v55, %v708_v62 }
 0x5f0   : > { %v711_v0 = vpop.xlane.xlu0 %710 }
 0x5f1   : > { %v714_v1 = vmul.f32 1.442695, %v712_v63  ;;  %v713_v2 = vsub.f32 %v703_v57, %v711_v0 }
 0x5f3   : > { %1229 = vpow2.f32 %v714_v1  ;;  %v716_v3 = vmul.f32 1.442695, %v713_v2 }
 0x5f5   : > { %1231 = vpow2.f32 %v716_v3 }
 0x5fd   : > { %v1230_v5 = vpop.eup %1229 }
 0x5fe   : > { %v718_v6 = vsel %vm582_vm4, %v1230_v5, 0.0 }
 0x5ff   : > { %v1232_v7 = vpop.eup %1231  ;;  %719 = vadd.xlane.f32.xlu0 %v718_v6 }
 0x600   : > { %v721_v59 = vsel %vm582_vm4, %v1232_v7, 0.0 }
 0x601   : > { %722 = vadd.xlane.f32.xlu1 %v721_v59 }
 0x612   : > { %779 = vrot.lane.b32.xlu1 %v653_v52, %s1410_s30 }
 0x615   : > { %729 = vrot.lane.b32.xlu0 %v1698_v4, %s1410_s30  ;;  %v1215_v4 = vld [vmem:[#allocation7 + $0x10] sm:$0xff]  }
 0x616   : > { %1094 = vmatpush3.bf16.msra.mxu0 %v1215_v4 }
 0x617   : > { %1095 = vmatprep.subr.bf16.mxu0 %v1403_v29 }
 0x61a   : > { %1096 = vmatpush3.bf16.msra.mxu0 %v1216_v19 }
 0x61b   : > { %1097 = vmatprep.subr.bf16.mxu0 %v1403_v29 }
 0x61e   : > { %1098 = vmatpush3.bf16.msra.mxu0 %v1217_v20 }
 0x61f   : > { %1099 = vmatprep.subr.bf16.mxu0 %v1403_v29 }
 0x622   : > { %1100 = vmatpush3.bf16.msra.mxu0 %v1218_v21 }
 0x623   : > { %1101 = vmatprep.subr.bf16.mxu0 %v1403_v29 }
 0x626   : > { %1102 = vmatpush3.bf16.msra.mxu0 %v1219_v22 }
 0x627   : > { %1103 = vmatprep.subr.bf16.mxu0 %v1403_v29 }
 0x62a   : > { %1104 = vmatpush3.bf16.msra.mxu0 %v1220_v23 }
 0x68c   : > { %v720_v8 = vpop.xlane.xlu0 %719 }
 0x68d   : > { %1233 = vrcp.f32 %v720_v8 }
 0x68e   : > { %v723_v9 = vpop.xlane.xlu1 %722 }
 0x68f   : > { %1235 = vrcp.f32 %v723_v9 }
 0x690   : > { %v730_v10 = vpop.permute.xlu0 %729 }
 0x691   : > { %v735_v11 = vsel %vm612_vm5, %v730_v10, 0 }
 0x692   : > { %1084 = vmatpush3.bf16.msra.mxu1 %v735_v11  ;;  %v780_v28 = vpop.permute.xlu1 %779 }
 0x693   : > { %v790_v30 = vsel %vm534_vm2, %v1729_v35, %v780_v28 }
 0x697   : > { %v1234_v12 = vpop.eup %1233 }
 0x698   : > { %v726_v14 = vmul.f32 %v1234_v12, %v1230_v5 }
 0x699   : > { %v1236_v13 = vpop.eup %1235 }
 0x69a   : > { %v727_v15 = vmul.f32 %v1236_v13, %v1232_v7 }
 0x69c   : > { %v728_v16 = vpack.c.bf16 %v727_v15, %v726_v14 }
 0x69e   : > { %1086 = vmatmul.mubr.msk.bf16.vlgmr.msra.gmra.mrb[12].mxu1 %vm582_vm4, %v728_v16 }
 0x771   : > { %v771_v24 = vpop.f32.mrb[12].mxu1 }
 0x772   : > { %783 = vrot.lane.b32.xlu1 %v771_v24, %s1409_s7  ;;  %v1087_v25 = vpop.f32.mrb[13].mxu1 }
 0x773   : > { %v774_v26 = vpop.f32.mrb[14].mxu1 }
 0x774   : > { %787 = vrot.lane.b32.xlu0 %v774_v26, %s1404_s16  ;;  %v1088_v27 = vpop.f32.mrb[15].mxu1 }
 0x7e4   : > { %v784_v31 = vpop.permute.xlu1 %783 }
 0x7e5   : > { %v792_v29 = vsel %vm791_vm6, %v790_v30, %v784_v31 }
 0x7e6   : > { %v788_v32 = vpop.permute.xlu0 %787 }
 0x7e7   : > { %v794_v33 = vsel %vm793_vm7, %v792_v29, %v788_v32 }
 0x7e8   : > { %v795_v36 = vpack.c.bf16 %v794_v33, %v794_v33 }
 0x7ea   : > { %1106 = vmatmul.mubr.bf16.vlgmr.msra.gmra.mrb[4].mxu0 %v795_v36 }
 0x8bd   : > { %v894_v37 = vpop.f32.mrb[4].mxu0 }
 0x8be   : > { %900 = vst [vmem:[%s295_s13] sm:$0xff] %v894_v37  ;;  %v1107_v38 = vpop.f32.mrb[5].mxu0 }
 0x8bf   : > { %v897_v39 = vpop.f32.mrb[6].mxu0 }
 0x8c0   : > { %1336 = shalt.err (!%p1333_p2)
}
 0x8c1   : > { %s1337_s20 = scalar_lea.hbm %s1761_s17, 128  ;;  %s1341_s7 = scalar_lea.hbm %s1809_s6, 256 }
 0x8c2   : > { %p1338_p13 = scmp.ne.s32.totalorder %s1761_s17, %s1337_s20  ;;  %p1342_p4 = scmp.lt.u32.totalorder %s1761_s17, %s1809_s6 }
 0x8c3   : > { %p1343_p7 = scmp.lt.u32.totalorder %s1341_s7, %s1337_s20  ;;  %p1345_p11 = scmp.lt.u32.totalorder %s1337_s20, %s1761_s17 }
 0x8c4   : > { %p1339_p6 = pnand %p1338_p13, %p1823_p0 }
 0x8c5   : > { %p1344_p8 = por %p1343_p7, %p1342_p4 }
 0x8c6   : > { %p1340_p10 = pneg %p1339_p6 }
 0x8c7   : > { %p1346_p1 = por %p1345_p11, %p1344_p8 }
 0x8c9   : > { %p1347_p3 = pnand %p1346_p1, %p1340_p10 }
 0x8cb   : > { %1350 = shalt.err (!%p1347_p3)
}
 0x8cc   : > { %1119 = dma.vmem_to_hbm [thread:$0]  (%p1823_p0), %s1756_s10, 128, %s1761_s17, %s902_s18   ;;  %v1108_v40 = vpop.f32.mrb[7].mxu0 }
 0x8cd PF: > { %s927_s27 = sand.u32 1, %s1381_s21   ;;  %p1824_p5 = scmp.ne.s32.totalorder %s1814_s28, 0 }
 0x8ce   : > { %p1825_p9 = scmp.ge.s32.totalorder %s1393_s24, 2  ;;  %s928_s29 = scalar_lea.sflag [#allocation4], %s927_s27 }
 0x8d0   : > { %p1133_p12 = pnand %p1825_p9, %p1824_p5 }
 0x8d2   : > { %1376 = dma.done.wait (!%p1133_p12), %s928_s29, 128  }
 0x8d3   : > { %1378 = vsyncadd (!%p1133_p12), %s928_s29, 4294967168  ;;  %p20_p2 = scmp.ge.s32.totalorder %s1557_s26, 4   ;;  %s1826_s21 = smov %s1385_s22 }
 0x8d4   : > { %s1827_s22 = smov %s1389_s23  ;;  %s1828_s23 = smov %s1566_s11 }
 0x8d5   : > { %s1829_s24 = smov %s1557_s26  ;;  %22 = sbr.rel (!%p20_p2) target bundleno = 6 (0x6), region = 97 }
 0x8dc   :  { %933 = vsyncpa [#allocation3], 1 }
 0x8dd   :  { %935 = vsyncpa [#allocation3 + $0x1], 1 }
 0x8de   :  { %936 = vsyncpa [#allocation6], 1 }
 0x8df   :  { %937 = vsyncpa [#allocation4], 1 }
 0x8e0   :  { %939 = vsyncpa [#allocation4 + $0x1], 1 }

</bundles_post_ra>
